<compile_context>
chip_gen: v5e
topology: v5e:2x2
jax: 0.10.0
libtpu: 0.0.40
codegen_flags: <defaults>
</compile_context>

<pallas_src>
import jax
import jax.numpy as jnp
from jax.experimental import pallas as pl
from jax.experimental.pallas import tpu as pltpu

_LANE = 128


def _sublane(dtype) -> int:
    # Sublane row granularity: 8 rows for 4-byte dtypes, 16 for bf16, 32 for int8/fp8.
    return max(8, 32 // jnp.dtype(dtype).itemsize)


def _round_up(x: int, m: int) -> int:
    return ((x + m - 1) // m) * m


def _dict_enc_kernel(x_ref, w_ref, o_ref):
    # Elementwise add of one (tile_s, tile_e) block.  The explicit cast keeps the
    # store well-typed if the weight table dtype differs from x (e.g. bf16 x + f32 w).
    o_ref[...] = (x_ref[...] + w_ref[...]).astype(o_ref.dtype)


def dictionary_encoding(x: jax.Array, weight: jax.Array,
                        *, target_block_bytes: int = 2 * 1024 * 1024) -> jax.Array:
    """x: (S, E); weight: (max_length, E) with max_length >= S. Returns x + weight[:S]."""
    S, E = x.shape
    assert weight.shape[1] == E and weight.shape[0] >= S
    itemsize = jnp.dtype(x.dtype).itemsize
    sub = _sublane(x.dtype)

    # --- embed-dim tile (lane axis): use full E unless even one sublane-group of
    # rows would blow the block budget; when tiling, keep a multiple of 128 so the
    # output stores stay lane-dense (unmasked vst, no vst.msk penalty).
    if E % _LANE == 0 and sub * E * itemsize > target_block_bytes:
        tile_e = max(_LANE, (target_block_bytes // (sub * itemsize)) // _LANE * _LANE)
    else:
        tile_e = E

    # --- row tile (sublane axis): as many rows as fit the ~2 MiB block budget,
    # a multiple of the sublane granularity, clamped to the (rounded-up) seq length
    # so tiny inputs become a single block.
    rows_budget = max(sub, target_block_bytes // (tile_e * itemsize))
    tile_s = max(sub, (rows_budget // sub) * sub)
    tile_s = min(tile_s, _round_up(S, sub))

    grid = (pl.cdiv(S, tile_s), pl.cdiv(E, tile_e))

    # VMEM budget: 3 arrays (x, weight, out) x 2 pipeline buffers x block, with ~2x
    # headroom; floored at 16 MiB and capped well under v7x's 64 MiB physical VMEM.
    block_bytes = tile_s * tile_e * itemsize
    vmem_limit = 3 * 2 * block_bytes * 2
    vmem_limit = max(vmem_limit, 16 * 1024 * 1024)
    vmem_limit = min(vmem_limit, 48 * 1024 * 1024)

    return pl.pallas_call(
        _dict_enc_kernel,
        out_shape=jax.ShapeDtypeStruct((S, E), x.dtype),
        grid_spec=pl.GridSpec(
            grid=grid,
            in_specs=[
                pl.BlockSpec((tile_s, tile_e), lambda i, j: (i, j)),  # x tile (i, j)
                pl.BlockSpec((tile_s, tile_e), lambda i, j: (i, j)),  # weight rows of tile i
            ],
            out_specs=pl.BlockSpec((tile_s, tile_e), lambda i, j: (i, j)),
        ),
        compiler_params=pltpu.CompilerParams(
            dimension_semantics=("parallel", "parallel"),
            vmem_limit_bytes=int(vmem_limit),
        ),
    )(x, weight)


if __name__ == "__main__":
    # Small shapes consistent with the module: seq_len=8, embed_dim=128, max_length=5000.
    seq_len, embed_dim, max_length = 8, 128, 5000

    key = jax.random.PRNGKey(0)
    kx, kw = jax.random.split(key)

    # Deterministic parameter init matching nn.init.normal_(std=0.01).
    weight = (0.01 * jax.random.normal(kw, (max_length, embed_dim))).astype(jnp.float32)
    x = jax.random.normal(kx, (seq_len, embed_dim), dtype=jnp.float32)

    out = jax.block_until_ready(dictionary_encoding(x, weight))
    ref = x + weight[:seq_len]
    assert out.shape == ref.shape and out.dtype == ref.dtype
    assert jnp.allclose(out, ref, atol=1e-6, rtol=1e-6), "mismatch vs reference (small)"

    # Second check: force a multi-block grid with a partial last row-tile to make
    # sure tiling / drop-on-write padding is handled correctly.
    seq_len2 = 300
    x2 = jax.random.normal(kx, (seq_len2, embed_dim), dtype=jnp.float32)
    out2 = jax.block_until_ready(
        dictionary_encoding(x2, weight, target_block_bytes=64 * 1024))
    ref2 = x2 + weight[:seq_len2]
    assert jnp.allclose(out2, ref2, atol=1e-6, rtol=1e-6), "mismatch vs reference (tiled)"

    print("KERNEL_OK")
</pallas_src>

<mosaic_0001>
module attributes {stable_mosaic.version = 11 : i64} {
  func.func @_dict_enc_kernel(%arg0: i32, %arg1: i32, %arg2: memref<8x128xf32, #tpu.memory_space<vmem>>, %arg3: memref<8x128xf32, #tpu.memory_space<vmem>>, %arg4: memref<8x128xf32, #tpu.memory_space<vmem>>) attributes {dimension_semantics = [#tpu.dimension_semantics<parallel>, #tpu.dimension_semantics<parallel>], iteration_bounds = array<i64: 1, 1>, scalar_prefetch = 0 : i64, scratch_operands = 0 : i64, tpu.core_type = #tpu.core_type<tc>, window_params = [{transform_indices = @transform_0, window_bounds = array<i64: 8, 128>}, {transform_indices = @transform_1, window_bounds = array<i64: 8, 128>}, {transform_indices = @transform_2, window_bounds = array<i64: 8, 128>}]} {
    %c0 = arith.constant 0 : index
    %c0_0 = arith.constant 0 : index
    %0 = vector.load %arg2[%c0, %c0_0] : memref<8x128xf32, #tpu.memory_space<vmem>>, vector<8x128xf32>
    %c0_1 = arith.constant 0 : index
    %c0_2 = arith.constant 0 : index
    %1 = vector.load %arg3[%c0_1, %c0_2] : memref<8x128xf32, #tpu.memory_space<vmem>>, vector<8x128xf32>
    %2 = arith.addf %0, %1 : vector<8x128xf32>
    %c0_3 = arith.constant 0 : index
    %c0_4 = arith.constant 0 : index
    %3 = vector.load %arg4[%c0_3, %c0_4] : memref<8x128xf32, #tpu.memory_space<vmem>>, vector<8x128xf32>
    tpu.vector_store %arg4[%c0_3, %c0_4], %2 {strides = array<i32>} : memref<8x128xf32, #tpu.memory_space<vmem>>, vector<8x128xf32>,
    return
  }
  func.func @transform_0(%arg0: i32, %arg1: i32) -> (i32, i32) {
    %c0_i32 = arith.constant 0 : i32
    return %arg0, %arg1 : i32, i32
  }
  func.func @transform_1(%arg0: i32, %arg1: i32) -> (i32, i32) {
    %c0_i32 = arith.constant 0 : i32
    return %arg0, %arg1 : i32, i32
  }
  func.func @transform_2(%arg0: i32, %arg1: i32) -> (i32, i32) {
    %c0_i32 = arith.constant 0 : i32
    return %arg0, %arg1 : i32, i32
  }
}

</mosaic_0001>

<bundles_post_ra>
// kernel: tpu_custom_call.1
= control target key start
LH: loop header
LB: loop body
LE: loop exit
PB: predicated region body
PF: predicated region fallthrough
CT: control target
= control target key end

     0   :  { %7 = vsyncpa [#allocation3], 0  ;;  %s170_s0 = inlined_call_operand.hbm [shape: f32[8,128], index: 0, kind: input, shape index: {}]   ;;  %s171_s1 = inlined_call_operand.hbm [shape: f32[5000,128], index: 1, kind: input, shape index: {}]   ;;  %s172_s2 = inlined_call_operand.hbm [shape: f32[8,128], index: 2, kind: output, shape index: {}]  }
   0x1   :  { %8 = vsyncpa [#allocation6], 0 }
   0x2   :  { %9 = vsyncpa [#allocation4], 0  ;;  %s15_s11 = sshll.u32 %s170_s0, 4  ;;  %s143_s12 = smov [#allocation2]   ;;  %s16_s11 = int_to_ptr.hbm [resolvable:$true] %s15_s11 }
   0x3   :  { %s17_s13 = sshll.u32 %s143_s12, 4  ;;  %s26_s16 = sshll.u32 %s171_s1, 4  ;;  %s18_s13 = int_to_ptr.vmem [resolvable:$true] %s17_s13  ;;  %s27_s16 = int_to_ptr.hbm [resolvable:$true] %s26_s16 }
   0x4   :  { %20 = dma.hbm_to_vmem [thread:$0]  %s16_s11, 128, %s18_s13, [#allocation3]  }
   0x5   :  { %s144_s17 = smov [#allocation5]  }
   0x6   :  { %s28_s18 = sshll.u32 %s144_s17, 4  ;;  %s29_s18 = int_to_ptr.vmem [resolvable:$true] %s28_s18 }
   0x7   :  { %31 = dma.hbm_to_vmem [thread:$0]  %s27_s16, 128, %s29_s18, [#allocation6]  }
   0x8   :  { %137 = dma.done.wait [#allocation3], 128  }
   0x9   :  { %138 = vsyncadd [#allocation3], 4294967168 }
   0xa   :  { %139 = dma.done.wait [#allocation6], 128  }
   0xb   :  { %140 = vsyncadd [#allocation6], 4294967168  ;;  %s145_s19 = smov [#allocation7]   ;;  %s51_s22 = sshll.u32 %s172_s2, 4  ;;  %v40_v0 = vld [vmem:[#allocation2] sm:$0xff]  ;;  %v41_v1 = vld [vmem:[#allocation5] sm:$0xff]  ;;  %s52_s22 = int_to_ptr.hbm [resolvable:$true] %s51_s22 }
   0xc   :  { %s49_s0 = sshll.u32 %s145_s19, 4  ;;  %v42_v2 = vadd.f32 %v41_v1, %v40_v0  ;;  %s50_s0 = int_to_ptr.vmem [resolvable:$true] %s49_s0 }
   0xe   :  { %43 = vst [vmem:[#allocation7] sm:$0xff] %v42_v2 }
   0xf   :  { %54 = dma.vmem_to_hbm [thread:$0]  %s50_s0, 128, %s52_s22, [#allocation4]  }
  0x10   :  { %141 = dma.done.wait [#allocation4], 128  }
  0x11   :  { %142 = vsyncadd [#allocation4], 4294967168 }
  0x12   :  { %59 = vsyncpa [#allocation3], 1 }
  0x13   :  { %60 = vsyncpa [#allocation6], 1 }
  0x14   :  { %61 = vsyncpa [#allocation4], 1 }

</bundles_post_ra>
